<compile_context>
chip_gen: v7x
topology: tpu7x:2x2x1
jax: 0.10.0
libtpu: 0.0.40
codegen_flags: <defaults>
</compile_context>

<pallas_src>
import functools

import jax
import jax.numpy as jnp
from jax import lax
from jax.experimental import pallas as pl
from jax.experimental.pallas import tpu as pltpu


def _round_up(n, m):
    return (n + m - 1) // m * m


def projection_head_kernel(x_ref, w1_ref, b1_ref, w2_ref, b2_ref,
                           gamma_ref, beta_ref, o_ref, *, true_p):
    # projected = Linear(E -> P); native-dtype operands, f32 accumulation.
    projected = jnp.dot(x_ref[...], w1_ref[...],
                        preferred_element_type=jnp.float32)
    projected = projected + b1_ref[...].astype(jnp.float32)

    # Exact GELU (erf formulation, matches nn.GELU() default).
    inv_sqrt2 = jnp.float32(0.7071067811865476)
    g = 0.5 * projected * (1.0 + lax.erf(projected * inv_sqrt2))

    # fc = Linear(P -> P)
    h = jnp.dot(g.astype(w2_ref.dtype), w2_ref[...],
                preferred_element_type=jnp.float32)

    # Fused bias + residual.
    y = h + b2_ref[...].astype(jnp.float32) + projected

    # LayerNorm over the TRUE feature width (eps=1e-5, biased variance).
    # Padded lanes of y are exactly zero (zero-padded weights/biases), so the
    # lane-axis sums equal sums over the true width; divide by true_p.
    inv_p = jnp.float32(1.0 / true_p)
    mean = jnp.sum(y, axis=-1, keepdims=True) * inv_p
    mean_sq = jnp.sum(y * y, axis=-1, keepdims=True) * inv_p
    var = mean_sq - mean * mean
    scale = lax.rsqrt(var + jnp.float32(1e-5))

    out = (y - mean) * scale * gamma_ref[...].astype(jnp.float32) \
          + beta_ref[...].astype(jnp.float32)
    o_ref[...] = out.astype(o_ref.dtype)


def projection_head(x, w1, b1, w2, b2, gamma, beta, *, block_b=256):
    """x: [B, E]; w1: [E, P]; b1/b2/gamma/beta: [P]; w2: [P, P] -> [B, P]."""
    B, E = x.shape
    P = w1.shape[1]

    # Lane-dense padding (multiples of 128) and sublane-friendly batch tiling.
    Ep = _round_up(E, 128)
    Pp = _round_up(P, 128)
    TB = min(_round_up(B, 8), _round_up(block_b, 8))   # batch tile, mult of 8
    Bp = _round_up(B, TB)
    grid = (Bp // TB,)

    out_dtype = x.dtype
    itemsize = jnp.dtype(jnp.float32).itemsize

    xp = jnp.pad(x, ((0, Bp - B), (0, Ep - E)))
    w1p = jnp.pad(w1, ((0, Ep - E), (0, Pp - P)))
    w2p = jnp.pad(w2, ((0, Pp - P), (0, Pp - P)))
    b1p = jnp.pad(b1.reshape(1, -1), ((0, 0), (0, Pp - P)))
    b2p = jnp.pad(b2.reshape(1, -1), ((0, 0), (0, Pp - P)))
    gp = jnp.pad(gamma.reshape(1, -1), ((0, 0), (0, Pp - P)))
    bp = jnp.pad(beta.reshape(1, -1), ((0, 0), (0, Pp - P)))

    kernel = functools.partial(projection_head_kernel, true_p=P)

    # VMEM budget: weights (resident, x2 buffers), streamed x/out tiles
    # (double-buffered), plus f32 intermediates. Raise the scoped limit only
    # if needed; never above 64 MiB (v7x physical per-TC VMEM).
    weight_bytes = (Ep * Pp + Pp * Pp + 4 * 8 * Pp) * itemsize
    stream_bytes = 2 * (TB * Ep + TB * Pp) * itemsize
    interm_bytes = 4 * TB * Pp * itemsize
    est = 2 * weight_bytes + stream_bytes + interm_bytes + (4 << 20)
    vmem_limit = int(min(max(est, 32 << 20), 64 << 20))

    cost = pl.CostEstimate(
        flops=2 * B * E * P + 2 * B * P * P + 12 * B * P,
        transcendentals=B * P,
        bytes_accessed=(B * E + E * P + P * P + 4 * P + B * P) * itemsize,
    )

    out = pl.pallas_call(
        kernel,
        out_shape=jax.ShapeDtypeStruct((Bp, Pp), out_dtype),
        grid=grid,
        in_specs=[
            pl.BlockSpec((TB, Ep), lambda i: (i, 0)),   # x tile (pipelined)
            # Constant-index blocks: fetched once, reused every grid step.
            pl.BlockSpec((Ep, Pp), lambda i: (0, 0)),   # projection weight
            pl.BlockSpec((1, Pp), lambda i: (0, 0)),    # projection bias
            pl.BlockSpec((Pp, Pp), lambda i: (0, 0)),   # fc weight
            pl.BlockSpec((1, Pp), lambda i: (0, 0)),    # fc bias
            pl.BlockSpec((1, Pp), lambda i: (0, 0)),    # layernorm gamma
            pl.BlockSpec((1, Pp), lambda i: (0, 0)),    # layernorm beta
        ],
        out_specs=pl.BlockSpec((TB, Pp), lambda i: (i, 0)),
        compiler_params=pltpu.CompilerParams(
            dimension_semantics=("parallel",),
            vmem_limit_bytes=vmem_limit),
        cost_estimate=cost,
    )(xp, w1p, b1p, w2p, b2p, gp, bp)

    return out[:B, :P]


def reference_jax(x, w1, b1, w2, b2, gamma, beta):
    projected = x.astype(jnp.float32) @ w1 + b1
    g = 0.5 * projected * (1.0 + lax.erf(projected / jnp.sqrt(jnp.float32(2.0))))
    h = g @ w2 + b2
    y = h + projected
    mean = jnp.mean(y, axis=-1, keepdims=True)
    var = jnp.mean((y - mean) ** 2, axis=-1, keepdims=True)
    return (y - mean) / jnp.sqrt(var + 1e-5) * gamma + beta


if __name__ == "__main__":
    B = 20           # batch (exercises batch padding + multi-step grid)
    E = 32           # embedding_dim
    P = 64           # projection_dim

    key = jax.random.PRNGKey(0)
    k_x, k_w1, k_b1, k_w2, k_b2 = jax.random.split(key, 5)

    x = jax.random.normal(k_x, (B, E), dtype=jnp.float32)

    # Parameter shapes match nn.Linear / nn.LayerNorm (weights stored [in,out]).
    w1 = jax.random.normal(k_w1, (E, P), dtype=jnp.float32) * (1.0 / jnp.sqrt(E))
    b1 = jax.random.normal(k_b1, (P,), dtype=jnp.float32) * 0.01
    w2 = jax.random.normal(k_w2, (P, P), dtype=jnp.float32) * (1.0 / jnp.sqrt(P))
    b2 = jax.random.normal(k_b2, (P,), dtype=jnp.float32) * 0.01
    gamma = jnp.ones((P,), dtype=jnp.float32)
    beta = jnp.zeros((P,), dtype=jnp.float32)

    # Small batch tile so the grid actually has >1 step in this tiny example.
    out = projection_head(x, w1, b1, w2, b2, gamma, beta, block_b=8)
    out = jax.block_until_ready(out)

    ref = reference_jax(x, w1, b1, w2, b2, gamma, beta)
    assert out.shape == (B, P)
    assert jnp.allclose(out, ref, atol=1e-4, rtol=1e-4), "mismatch vs reference"

    print("KERNEL_OK")
</pallas_src>

<mosaic_0001>
module attributes {stable_mosaic.version = 11 : i64} {
  func.func @projection_head_kernel(%arg0: i32, %arg1: memref<8x128xf32, #tpu.memory_space<vmem>>, %arg2: memref<128x128xf32, #tpu.memory_space<vmem>>, %arg3: memref<1x128xf32, #tpu.memory_space<vmem>>, %arg4: memref<128x128xf32, #tpu.memory_space<vmem>>, %arg5: memref<1x128xf32, #tpu.memory_space<vmem>>, %arg6: memref<1x128xf32, #tpu.memory_space<vmem>>, %arg7: memref<1x128xf32, #tpu.memory_space<vmem>>, %arg8: memref<8x128xf32, #tpu.memory_space<vmem>>) attributes {dimension_semantics = [#tpu.dimension_semantics<parallel>], iteration_bounds = array<i64: 3>, scalar_prefetch = 0 : i64, scratch_operands = 0 : i64, tpu.core_type = #tpu.core_type<tc>, window_params = [{transform_indices = @transform_0, window_bounds = array<i64: 8, 128>}, {pipeline_mode = #tpu.pipeline_mode<synchronous>, transform_indices = @transform_1, window_bounds = array<i64: 128, 128>}, {pipeline_mode = #tpu.pipeline_mode<synchronous>, transform_indices = @transform_2, window_bounds = array<i64: 1, 128>}, {pipeline_mode = #tpu.pipeline_mode<synchronous>, transform_indices = @transform_3, window_bounds = array<i64: 128, 128>}, {pipeline_mode = #tpu.pipeline_mode<synchronous>, transform_indices = @transform_4, window_bounds = array<i64: 1, 128>}, {pipeline_mode = #tpu.pipeline_mode<synchronous>, transform_indices = @transform_5, window_bounds = array<i64: 1, 128>}, {pipeline_mode = #tpu.pipeline_mode<synchronous>, transform_indices = @transform_6, window_bounds = array<i64: 1, 128>}, {transform_indices = @transform_7, window_bounds = array<i64: 8, 128>}]} {
    %c0 = arith.constant 0 : index
    %c0_0 = arith.constant 0 : index
    %0 = vector.load %arg1[%c0, %c0_0] : memref<8x128xf32, #tpu.memory_space<vmem>>, vector<8x128xf32>
    %c0_1 = arith.constant 0 : index
    %c0_2 = arith.constant 0 : index
    %1 = vector.load %arg2[%c0_1, %c0_2] : memref<128x128xf32, #tpu.memory_space<vmem>>, vector<128x128xf32>
    %cst = arith.constant dense<0.000000e+00> : vector<8x128xf32>
    %2 = tpu.matmul %0, %1, %cst {dimension_numbers = #tpu.dot_dimension_numbers<[1], [0], [0], [1], [0, 0, 1, 1], [], []>} : vector<8x128xf32>, vector<128x128xf32>, vector<8x128xf32> -> vector<8x128xf32>
    %c0_3 = arith.constant 0 : index
    %c0_4 = arith.constant 0 : index
    %3 = vector.load %arg3[%c0_3, %c0_4] : memref<1x128xf32, #tpu.memory_space<vmem>>, vector<1x128xf32>
    %4 = vector.broadcast %3 : vector<1x128xf32> to vector<8x128xf32>
    %5 = arith.addf %2, %4 : vector<8x128xf32>
    %cst_5 = arith.constant 5.000000e-01 : f32
    %6 = vector.broadcast %cst_5 : f32 to vector<8x128xf32>
    %7 = arith.mulf %6, %5 : vector<8x128xf32>
    %cst_6 = arith.constant 0.707106769 : f32
    %8 = vector.broadcast %cst_6 : f32 to vector<8x128xf32>
    %9 = arith.mulf %5, %8 : vector<8x128xf32>
    %10 = math.erf %9 : vector<8x128xf32>
    %cst_7 = arith.constant 1.000000e+00 : f32
    %11 = vector.broadcast %cst_7 : f32 to vector<8x128xf32>
    %12 = arith.addf %11, %10 : vector<8x128xf32>
    %13 = arith.mulf %7, %12 : vector<8x128xf32>
    %c0_8 = arith.constant 0 : index
    %c0_9 = arith.constant 0 : index
    %14 = vector.load %arg4[%c0_8, %c0_9] : memref<128x128xf32, #tpu.memory_space<vmem>>, vector<128x128xf32>
    %cst_10 = arith.constant dense<0.000000e+00> : vector<8x128xf32>
    %15 = tpu.matmul %13, %14, %cst_10 {dimension_numbers = #tpu.dot_dimension_numbers<[1], [0], [0], [1], [0, 0, 1, 1], [], []>} : vector<8x128xf32>, vector<128x128xf32>, vector<8x128xf32> -> vector<8x128xf32>
    %c0_11 = arith.constant 0 : index
    %c0_12 = arith.constant 0 : index
    %16 = vector.load %arg5[%c0_11, %c0_12] : memref<1x128xf32, #tpu.memory_space<vmem>>, vector<1x128xf32>
    %17 = vector.broadcast %16 : vector<1x128xf32> to vector<8x128xf32>
    %18 = arith.addf %15, %17 : vector<8x128xf32>
    %19 = arith.addf %18, %5 : vector<8x128xf32>
    %cst_13 = arith.constant dense<0.000000e+00> : vector<8xf32>
    %20 = vector.multi_reduction <add>, %19, %cst_13 [1] : vector<8x128xf32> to vector<8xf32>
    %21 = vector.shape_cast %20 : vector<8xf32> to vector<8x1xf32>
    %cst_14 = arith.constant 1.562500e-02 : f32
    %22 = vector.broadcast %cst_14 : f32 to vector<8x1xf32>
    %23 = arith.mulf %21, %22 : vector<8x1xf32>
    %24 = arith.mulf %19, %19 : vector<8x128xf32>
    %cst_15 = arith.constant dense<0.000000e+00> : vector<8xf32>
    %25 = vector.multi_reduction <add>, %24, %cst_15 [1] : vector<8x128xf32> to vector<8xf32>
    %26 = vector.shape_cast %25 : vector<8xf32> to vector<8x1xf32>
    %cst_16 = arith.constant 1.562500e-02 : f32
    %27 = vector.broadcast %cst_16 : f32 to vector<8x1xf32>
    %28 = arith.mulf %26, %27 : vector<8x1xf32>
    %29 = arith.mulf %23, %23 : vector<8x1xf32>
    %30 = arith.subf %28, %29 : vector<8x1xf32>
    %cst_17 = arith.constant 9.99999974E-6 : f32
    %31 = vector.broadcast %cst_17 : f32 to vector<8x1xf32>
    %32 = arith.addf %30, %31 : vector<8x1xf32>
    %33 = math.rsqrt %32 : vector<8x1xf32>
    %34 = vector.broadcast %23 : vector<8x1xf32> to vector<8x128xf32>
    %35 = arith.subf %19, %34 : vector<8x128xf32>
    %36 = vector.broadcast %33 : vector<8x1xf32> to vector<8x128xf32>
    %37 = arith.mulf %35, %36 : vector<8x128xf32>
    %c0_18 = arith.constant 0 : index
    %c0_19 = arith.constant 0 : index
    %38 = vector.load %arg6[%c0_18, %c0_19] : memref<1x128xf32, #tpu.memory_space<vmem>>, vector<1x128xf32>
    %39 = vector.broadcast %38 : vector<1x128xf32> to vector<8x128xf32>
    %40 = arith.mulf %37, %39 : vector<8x128xf32>
    %c0_20 = arith.constant 0 : index
    %c0_21 = arith.constant 0 : index
    %41 = vector.load %arg7[%c0_20, %c0_21] : memref<1x128xf32, #tpu.memory_space<vmem>>, vector<1x128xf32>
    %42 = vector.broadcast %41 : vector<1x128xf32> to vector<8x128xf32>
    %43 = arith.addf %40, %42 : vector<8x128xf32>
    %c0_22 = arith.constant 0 : index
    %c0_23 = arith.constant 0 : index
    %44 = vector.load %arg8[%c0_22, %c0_23] : memref<8x128xf32, #tpu.memory_space<vmem>>, vector<8x128xf32>
    tpu.vector_store %arg8[%c0_22, %c0_23], %43 {strides = array<i32>} : memref<8x128xf32, #tpu.memory_space<vmem>>, vector<8x128xf32>,
    return
  }
  func.func @transform_0(%arg0: i32) -> (i32, i32) {
    %c0_i32 = arith.constant 0 : i32
    %c0_i32_0 = arith.constant 0 : i32
    return %arg0, %c0_i32 : i32, i32
  }
  func.func @transform_1(%arg0: i32) -> (i32, i32) {
    %c0_i32 = arith.constant 0 : i32
    %c0_i32_0 = arith.constant 0 : i32
    %c0_i32_1 = arith.constant 0 : i32
    return %c0_i32, %c0_i32_0 : i32, i32
  }
  func.func @transform_2(%arg0: i32) -> (i32, i32) {
    %c0_i32 = arith.constant 0 : i32
    %c0_i32_0 = arith.constant 0 : i32
    %c0_i32_1 = arith.constant 0 : i32
    return %c0_i32, %c0_i32_0 : i32, i32
  }
  func.func @transform_3(%arg0: i32) -> (i32, i32) {
    %c0_i32 = arith.constant 0 : i32
    %c0_i32_0 = arith.constant 0 : i32
    %c0_i32_1 = arith.constant 0 : i32
    return %c0_i32, %c0_i32_0 : i32, i32
  }
  func.func @transform_4(%arg0: i32) -> (i32, i32) {
    %c0_i32 = arith.constant 0 : i32
    %c0_i32_0 = arith.constant 0 : i32
    %c0_i32_1 = arith.constant 0 : i32
    return %c0_i32, %c0_i32_0 : i32, i32
  }
  func.func @transform_5(%arg0: i32) -> (i32, i32) {
    %c0_i32 = arith.constant 0 : i32
    %c0_i32_0 = arith.constant 0 : i32
    %c0_i32_1 = arith.constant 0 : i32
    return %c0_i32, %c0_i32_0 : i32, i32
  }
  func.func @transform_6(%arg0: i32) -> (i32, i32) {
    %c0_i32 = arith.constant 0 : i32
    %c0_i32_0 = arith.constant 0 : i32
    %c0_i32_1 = arith.constant 0 : i32
    return %c0_i32, %c0_i32_0 : i32, i32
  }
  func.func @transform_7(%arg0: i32) -> (i32, i32) {
    %c0_i32 = arith.constant 0 : i32
    %c0_i32_0 = arith.constant 0 : i32
    return %arg0, %c0_i32 : i32, i32
  }
}

</mosaic_0001>

<bundles_post_ra>
// kernel: tpu_custom_call.1
= control target key start
LH: loop header
LB: loop body
LE: loop exit
PB: predicated region body
PF: predicated region fallthrough
CT: control target
= control target key end

     0   :  { %12 = vsyncpa [#allocation3], 0  ;;  %s1359_s0 = inlined_call_operand.hbm [shape: f32[24,128], index: 0, kind: input, shape index: {}]   ;;  %s1360_s1 = inlined_call_operand.hbm [shape: f32[128,128], index: 1, kind: input, shape index: {}]   ;;  %s1361_s2 = inlined_call_operand.vmem [shape: f32[1,128], index: 2, kind: input, shape index: {}]   ;;  %s1362_s3 = inlined_call_operand.hbm [shape: f32[128,128], index: 3, kind: input, shape index: {}]   ;;  %s1363_s4 = inlined_call_operand.vmem [shape: f32[1,128], index: 4, kind: input, shape index: {}]   ;;  %s1364_s5 = inlined_call_operand.vmem [shape: f32[1,128], index: 5, kind: input, shape index: {}]   ;;  %s1365_s6 = inlined_call_operand.vmem [shape: f32[1,128], index: 6, kind: input, shape index: {}]   ;;  %s1366_s7 = inlined_call_operand.hbm [shape: f32[24,128], index: 7, kind: output, shape index: {}]  }
   0x1   :  { %14 = vsyncpa [#allocation3 + $0x1], 0 }
   0x2   :  { %15 = vsyncpa [#allocation6], 0 }
   0x3   :  { %16 = vsyncpa [#allocation4], 0 }
   0x4   :  { %18 = vsyncpa [#allocation4 + $0x1], 0  ;;  %s1104_s24 = smov 0   ;;  %s1106_s25 = smov 0  }
   0x5   :  { %s1108_s26 = smov 0   ;;  %s1110_s27 = smov 0  }
   0x6 LB: > { %s1125_s28 = sadd.s32 4294967295, %s1053_s27   ;;  %s649_s29 = sadd.s32 4294967294, %s1053_s27   ;;  %s1053_s27 = sphi %s1110_s27, %s1385_s27   ;;  %s1049_s26 = sphi %s1108_s26, %s1384_s26   ;;  %s1045_s25 = sphi %s1106_s25, %s1383_s25   ;;  %s1041_s24 = sphi %s1104_s24, %s1382_s24  }
   0x7   : > { %p44_p0 = scmp.ne.s32.totalorder %s1045_s25, %s1041_s24  ;;  %p1367_p1 = scmp.eq.s32.totalorder %s1125_s28, 0 }
   0x8   : > { %p200_p3 = scmp.eq.s32.totalorder %s649_s29, 2  ;;  %p650_p5 = scmp.ge.s32.totalorder %s1053_s27, 1 }
   0x9   : > { %p1134_p4 = por %p1367_p1, %p44_p0  ;;  %p207_p7 = scmp.lt.s32.totalorder %s1053_s27, 4 }
   0xa   : > { %p1139_p6 = por %p200_p3, %p44_p0  ;;  %s1055_s10 = smov [#allocation5]  }
   0xb   : > { %s1370_s30 = scalar_select %p1134_p4, 1, 0 }
   0xc   : > { %s1371_s8 = scalar_select %p1139_p6, 1, 0 }
   0xd   : > { %p1144_p8 = pnand %p650_p5, %p207_p7  ;;  %s219_s11 = sshll.u32 %s1055_s10, 4  ;;  %s220_s11 = int_to_ptr.vmem [resolvable:$true] %s219_s11 }
   0xe   : > { %s1056_s13 = smov [#allocation7]   ;;  %s897_s17 = scalar_lea.hbm %s1360_s1, 2048 }
   0xf   : > { %s1372_s9 = scalar_select %p1144_p8, 1, 0 }
  0x10   : > { %p833_p9 = pneg %p1144_p8  ;;  %s235_s14 = sshll.u32 %s1056_s13, 4  ;;  %s1156_s14 = int_to_ptr.vmem [resolvable:$true] %s235_s14 }
  0x11   : > { %p898_p11 = scmp.ne.s32.totalorder %s1360_s1, %s897_s17  ;;  %p904_p3 = scmp.lt.u32.totalorder %s897_s17, %s1360_s1 }
  0x12   : > { %p1152_p10 = pnand %p833_p9, %p1367_p1 }
  0x14   : > { %p899_p12 = pneg %p1152_p10 }
  0x16   : > { %p900_p13 = pnand %p899_p12, %p898_p11 }
  0x18   : > { %p901_p0 = pneg %p900_p13 }
  0x1a   : > { %p906_p5 = pnand %p904_p3, %p901_p0 }
  0x1c   : > { %909 = shalt.err (!%p906_p5)
}
  0x1d   : > { %s910_s22 = scalar_lea.vmem %s220_s11, 2048  ;;  %p918_p2 = scmp.lt.s32.totalorder %s220_s11, %s220_s11 }
  0x1e   : > { %p911_p7 = scmp.ne.s32.totalorder %s220_s11, %s910_s22  ;;  %p919_p6 = scmp.lt.s32.totalorder %s910_s22, %s910_s22 }
  0x20   : > { %p913_p9 = pnand %p911_p7, %p899_p12  ;;  %p920_p4 = por %p919_p6, %p918_p2 }
  0x22   : > { %p914_p1 = pneg %p913_p9 }
  0x24   : > { %p921_p8 = pnand %p920_p4, %p914_p1 }
  0x26   : > { %924 = shalt.err (!%p921_p8)
}
  0x27   : > { %s1057_s23 = smov 128   ;;  %s1058_s29 = smov 8  }
  0x28   : > { %836 = dma.hbm_to_vmem [thread:$0]  (!%p1152_p10), %s1360_s1, 2048, %s220_s11, [#allocation6], %s1057_s23, %s1057_s23, %s1058_s29  }
  0x29   : > { %s925_s17 = scalar_lea.hbm %s1362_s3, 2048 }
  0x2a   : > { %p926_p11 = scmp.ne.s32.totalorder %s1362_s3, %s925_s17  ;;  %p932_p4 = scmp.lt.u32.totalorder %s925_s17, %s1362_s3 }
  0x2c   : > { %p928_p1 = pnand %p926_p11, %p899_p12 }
  0x2e   : > { %p929_p2 = pneg %p928_p1 }
  0x30   : > { %p934_p6 = pnand %p932_p4, %p929_p2 }
  0x32   : > { %937 = shalt.err (!%p934_p6)
}
  0x33   : > { %s938_s11 = scalar_lea.vmem %s1156_s14, 2048  ;;  %p946_p3 = scmp.lt.s32.totalorder %s1156_s14, %s1156_s14 }
  0x34   : > { %p939_p8 = scmp.ne.s32.totalorder %s1156_s14, %s938_s11  ;;  %p947_p5 = scmp.lt.s32.totalorder %s938_s11, %s938_s11 }
  0x36   : > { %p941_p13 = pnand %p939_p8, %p899_p12  ;;  %p948_p7 = por %p947_p5, %p946_p3 }
  0x38   : > { %p942_p0 = pneg %p941_p13 }
  0x3a   : > { %p949_p9 = pnand %p948_p7, %p942_p0 }
  0x3c   : > { %952 = shalt.err (!%p949_p9)
}
  0x3d   : > { %839 = dma.hbm_to_vmem [thread:$0]  (!%p1152_p10), %s1362_s3, 2048, %s1156_s14, [#allocation6], %s1057_s23, %s1057_s23, %s1058_s29  }
  0x3e   : > { %s1206_s13 = sadd.s32 1, %s1053_s27   ;;  %s31_s12 = sadd.s32 1, %s1049_s26 }
  0x3f   : > { %s28_s15 = ssub.s32 %s1053_s27, %s1206_s13  ;;  %p38_p12 = scmp.ne.s32.totalorder %s1049_s26, %s1045_s25 }
  0x40   : > { %p29_p11 = scmp.eq.s32.totalorder %s28_s15, 0  ;;  %p39_p1 = scmp.eq.s32.totalorder %s1053_s27, 0 }
  0x41   : > { %p1374_p2 = scmp.eq.s32.totalorder %s1125_s28, 2  ;;  %p850_p6 = scmp.lt.s32.totalorder %s1053_s27, 3 }
  0x42   : > { %s1222_s17 = scalar_select %p29_p11, %s1049_s26, %s31_s12  }
  0x43   : > { %p1216_p4 = por %p1374_p2, %p38_p12  ;;  %p40_p8 = por %p39_p1, %p38_p12 }
  0x44   : > { %s258_s18 = sand.u32 1, %s1049_s26   ;;  %s655_s14 = sshll.u32 %s1053_s27, 7 }
  0x45   : > { %s654_s19 = sshll.u32 %s258_s18, 3  ;;  %s1229_s20 = scalar_lea.hbm %s1359_s0, %s655_s14 }
  0x46   : > { %s262_s21 = scalar_lea.vmem [#allocation2], %s654_s19  ;;  %p1233_p10 = pnand %p850_p6, %p40_p8 }
  0x47   : > { %s269_s11 = sshll.u32 %s262_s21, 4  ;;  %s259_s10 = scalar_lea.sflag [#allocation3], %s258_s18  ;;  %s1231_s11 = int_to_ptr.vmem [resolvable:$true] %s269_s11 }
  0x48   : > { %s953_s12 = scalar_lea.hbm %s1229_s20, 128  ;;  %p955_p0 = pneg %p1233_p10 }
  0x49   : > { %p954_p13 = scmp.ne.s32.totalorder %s1229_s20, %s953_s12  ;;  %s958_s14 = scalar_lea.hbm %s1359_s0, 384 }
  0x4a   : > { %p959_p7 = scmp.lt.u32.totalorder %s1229_s20, %s1359_s0  ;;  %p960_p9 = scmp.lt.u32.totalorder %s958_s14, %s953_s12 }
  0x4b   : > { %p956_p3 = pnand %p955_p0, %p954_p13  ;;  %p962_p11 = scmp.lt.u32.totalorder %s953_s12, %s1229_s20 }
  0x4c   : > { %p961_p12 = por %p960_p9, %p959_p7 }
  0x4d   : > { %p957_p5 = pneg %p956_p3 }
  0x4e   : > { %p963_p1 = por %p962_p11, %p961_p12 }
  0x50   : > { %p964_p2 = pnand %p963_p1, %p957_p5 }
  0x52   : > { %967 = shalt.err (!%p964_p2)
}
  0x53   : > { %s968_s18 = scalar_lea.vmem %s1231_s11, 128  ;;  %s1059_s21 = smov [#allocation2]  }
  0x54   : > { %p969_p6 = scmp.ne.s32.totalorder %s1231_s11, %s968_s18  ;;  %s973_s15 = sshll.u32 %s1059_s21, 4  ;;  %s974_s15 = int_to_ptr.vmem [resolvable:$false] %s973_s15 }
  0x55   : > { %s975_s19 = scalar_lea.vmem %s974_s15, 256  ;;  %p976_p3 = scmp.lt.s32.totalorder %s1231_s11, %s974_s15 }
  0x56   : > { %p971_p8 = pnand %p969_p6, %p955_p0  ;;  %p977_p7 = scmp.lt.s32.totalorder %s975_s19, %s968_s18 }
  0x58   : > { %p972_p13 = pneg %p971_p8  ;;  %p978_p9 = por %p977_p7, %p976_p3 }
  0x5a   : > { %p979_p12 = pnand %p978_p9, %p972_p13 }
  0x5c   : > { %982 = shalt.err (!%p979_p12)
}
  0x5d   : > { %843 = dma.hbm_to_vmem [thread:$0]  (!%p1233_p10), %s1229_s20, 128, %s1231_s11, %s259_s10  }
  0x5e   : > { %p1377_p5 = scmp.ne.s32.totalorder %s1372_s9, 0 }
  0x5f   : > { %s1265_s12 = sand.u32 (!%p1377_p5), 1, %s1045_s25   ;;  %p1378_p0 = scmp.ne.s32.totalorder (!%p1377_p5), %s1370_s30, 0 }
  0x60   : > { %278 = sbr.rel (%p1377_p5) target bundleno = 771 (0x303), region = 48  ;;  %s657_s14 = sshll.u32 (!%p1377_p5), %s1265_s12, 3 }
  0x61   : > { %s281_s23 = scalar_lea.sflag (!%p1377_p5), [#allocation3], %s1265_s12  ;;  %s1271_s29 = scalar_lea.vmem (!%p1377_p5), [#allocation2], %s657_s14 }
  0x67   : > { %1028 = dma.done.wait (%p1378_p0), %s281_s23, 128  }
  0x68   : > { %1030 = vsyncadd (%p1378_p0), %s281_s23, 4294967168  ;;  %p1379_p10 = scmp.eq.s32.totalorder %s1125_s28, 0 }
  0x6a   : > { %1032 = dma.done.wait (%p1379_p10), [#allocation6], 4096   ;;  %p1380_p11 = pmov %p1379_p10 }
  0x6b   : > { %v1060_v0 = vmov 0.0|0.0   ;;  %vm1061_vm0 = vmmov 0   ;;  %v1062_v1 = vmov 0.0   ;;  %v324_v2 = vld [vmem:[#allocation5] sm:$0xff]  ;;  %v325_v3 = vld [vmem:[#allocation5 + $0x8] sm:$0xff]  ;;  %v326_v4 = vld [vmem:[#allocation5 + $0x10] sm:$0xff] }
  0x6c   : > { %1034 = vsyncadd (%p1380_p11), [#allocation6], 4294963200  ;;  %773 = vmatprep.subr.bf16.mxu0 %v1060_v0  ;;  %735 = vmatprep.mubr.msk.f32.mxu0 %vm1061_vm0, %v1062_v1  ;;  %v774_v5 = vpack.c.bf16 %v325_v3, %v324_v2  ;;  %v327_v6 = vld [vmem:[#allocation5 + $0x18] sm:$0xff]  ;;  %v328_v8 = vld [vmem:[#allocation5 + $0x20] sm:$0xff]  ;;  %s666_s15 = sshll.u32 %s1125_s28, 7  ;;  %s322_s19 = scalar_lea.vmem [#allocation8], %s657_s14 }
  0x6d   : > { %797 = vmatprep.subr.bf16.mxu1 %v1060_v0  ;;  %770 = vmatprep.mubr.msk.f32.mxu1 %vm1061_vm0, %v1062_v1  ;;  %v777_v7 = vpack.c.bf16 %v327_v6, %v326_v4  ;;  %v329_v9 = vld [vmem:[#allocation5 + $0x28] sm:$0xff]  ;;  %v422_v10 = vld [vmem:[#allocation7] sm:$0xff]  ;;  %v424_v12 = vld [vmem:[#allocation7 + $0x10] sm:$0xff]  ;;  %s560_s23 = sshll.u32 %s322_s19, 4  ;;  %s1316_s9 = scalar_lea.hbm %s1366_s7, %s666_s15  ;;  %s1318_s23 = int_to_ptr.vmem [resolvable:$true] %s560_s23 }
  0x6e   : > { %775 = vmatpush3.bf16.msra.mxu0 %v774_v5  ;;  %v423_v11 = vld [vmem:[#allocation7 + $0x8] sm:$0xff]  ;;  %v425_v13 = vld [vmem:[#allocation7 + $0x18] sm:$0xff]  ;;  %v780_v14 = vpack.c.bf16 %v329_v9, %v328_v8  ;;  %v330_v16 = vld [vmem:[#allocation5 + $0x30] sm:$0xff]  ;;  %s547_s20 = scalar_lea.sflag [#allocation4], %s1265_s12  ;;  %s983_s11 = scalar_lea.vmem %s1318_s23, 128 }
  0x6f   : > { %776 = vmatprep.subr.bf16.mxu0 %v1060_v0  ;;  %v798_v15 = vpack.c.bf16 %v423_v11, %v422_v10  ;;  %v331_v17 = vld [vmem:[#allocation5 + $0x38] sm:$0xff]  ;;  %v801_v18 = vpack.c.bf16 %v425_v13, %v424_v12  ;;  %v426_v19 = vld [vmem:[#allocation7 + $0x20] sm:$0xff]  ;;  %v427_v20 = vld [vmem:[#allocation7 + $0x28] sm:$0xff]  ;;  %p984_p1 = scmp.ne.s32.totalorder %s1318_s23, %s983_s11  ;;  %s1063_s28 = smov [#allocation8]  }
  0x70   : > { %v783_v21 = vpack.c.bf16 %v331_v17, %v330_v16  ;;  %v332_v22 = vld [vmem:[#allocation5 + $0x40] sm:$0xff]  ;;  %v333_v23 = vld [vmem:[#allocation5 + $0x48] sm:$0xff]  ;;  %v804_v24 = vpack.c.bf16 %v427_v20, %v426_v19  ;;  %v334_v26 = vld [vmem:[#allocation5 + $0x50] sm:$0xff]  ;;  %s987_s14 = sshll.u32 %s1063_s28, 4  ;;  %s988_s14 = int_to_ptr.vmem [resolvable:$false] %s987_s14 }
  0x71   : > { %799 = vmatpush3.bf16.msra.mxu1 %v798_v15  ;;  %v786_v25 = vpack.c.bf16 %v333_v23, %v332_v22  ;;  %v335_v27 = vld [vmem:[#allocation5 + $0x58] sm:$0xff]  ;;  %v336_v29 = vld [vmem:[#allocation5 + $0x60] sm:$0xff]  ;;  %v337_v30 = vld [vmem:[#allocation5 + $0x68] sm:$0xff]  ;;  %p985_p2 = pnand %p984_p1, %p1216_p4  ;;  %s989_s22 = scalar_lea.vmem %s988_s14, 256 }
  0x72   : > { %778 = vmatpush3.bf16.msra.mxu0 %v777_v7  ;;  %800 = vmatprep.subr.bf16.mxu1 %v1060_v0  ;;  %v789_v28 = vpack.c.bf16 %v335_v27, %v334_v26  ;;  %v792_v31 = vpack.c.bf16 %v337_v30, %v336_v29  ;;  %v338_v32 = vld [vmem:[#allocation5 + $0x70] sm:$0xff]  ;;  %v339_v33 = vld [vmem:[#allocation5 + $0x78] sm:$0xff]  ;;  %v430_v39 = vld [vmem:[#allocation7 + $0x40] sm:$0xff]  ;;  %p990_p8 = scmp.lt.s32.totalorder %s1318_s23, %s988_s14  ;;  %p991_p13 = scmp.lt.s32.totalorder %s989_s22, %s983_s11 }
  0x73   : > { %779 = vmatprep.subr.bf16.mxu0 %v1060_v0  ;;  %v795_v34 = vpack.c.bf16 %v339_v33, %v338_v32  ;;  %v323_v35 = vld [vmem:[%s1271_s29] sm:$0xff]  ;;  %v431_v40 = vld [vmem:[#allocation7 + $0x48] sm:$0xff]  ;;  %v434_v45 = vld [vmem:[#allocation7 + $0x60] sm:$0xff]  ;;  %p986_p6 = pneg %p985_p2 }
  0x74   : > { %v428_v36 = vld [vmem:[#allocation7 + $0x30] sm:$0xff]  ;;  %v429_v37 = vld [vmem:[#allocation7 + $0x38] sm:$0xff]  ;;  %v810_v41 = vpack.c.bf16 %v431_v40, %v430_v39  ;;  %v435_v46 = vld [vmem:[#allocation7 + $0x68] sm:$0xff]  ;;  %p992_p3 = por %p991_p13, %p990_p8 }
  0x75   : > { %802 = vmatpush3.bf16.msra.mxu1 %v801_v18  ;;  %v807_v38 = vpack.c.bf16 %v429_v37, %v428_v36  ;;  %v432_v42 = vld [vmem:[#allocation7 + $0x50] sm:$0xff]  ;;  %v433_v43 = vld [vmem:[#allocation7 + $0x58] sm:$0xff]  ;;  %v816_v47 = vpack.c.bf16 %v435_v46, %v434_v45 }
  0x76   : > { %781 = vmatpush3.bf16.msra.mxu0 %v780_v14  ;;  %803 = vmatprep.subr.bf16.mxu1 %v1060_v0  ;;  %v813_v44 = vpack.c.bf16 %v433_v43, %v432_v42  ;;  %v436_v48 = vld [vmem:[#allocation7 + $0x70] sm:$0xff]  ;;  %v437_v49 = vld [vmem:[#allocation7 + $0x78] sm:$0xff]  ;;  %p993_p7 = pnand %p992_p3, %p986_p6 }
  0x77   : > { %782 = vmatprep.subr.bf16.mxu0 %v1060_v0  ;;  %v819_v50 = vpack.c.bf16 %v437_v49, %v436_v48  ;;  %v661_v51 = vld [vmem:[%s1361_s2] ss:$0 sm:$0xff] }
  0x78   : > { %v662_v60 = vld [vmem:[%s1363_s4] ss:$0 sm:$0xff] }
  0x79   : > { %805 = vmatpush3.bf16.msra.mxu1 %v804_v24  ;;  %v663_v11 = vld [vmem:[%s1364_s5] ss:$0 sm:$0xff] }
  0x7a   : > { %784 = vmatpush3.bf16.msra.mxu0 %v783_v21  ;;  %806 = vmatprep.subr.bf16.mxu1 %v1060_v0  ;;  %v664_v13 = vld [vmem:[%s1365_s6] ss:$0 sm:$0xff] }
  0x7b   : > { %785 = vmatprep.subr.bf16.mxu0 %v1060_v0 }
  0x7d   : > { %808 = vmatpush3.bf16.msra.mxu1 %v807_v38 }
  0x7e   : > { %787 = vmatpush3.bf16.msra.mxu0 %v786_v25  ;;  %809 = vmatprep.subr.bf16.mxu1 %v1060_v0 }
  0x7f   : > { %788 = vmatprep.subr.bf16.mxu0 %v1060_v0 }
  0x81   : > { %811 = vmatpush3.bf16.msra.mxu1 %v810_v41 }
  0x82   : > { %790 = vmatpush3.bf16.msra.mxu0 %v789_v28  ;;  %812 = vmatprep.subr.bf16.mxu1 %v1060_v0 }
  0x83   : > { %791 = vmatprep.subr.bf16.mxu0 %v1060_v0 }
  0x85   : > { %814 = vmatpush3.bf16.msra.mxu1 %v813_v44 }
  0x86   : > { %793 = vmatpush3.bf16.msra.mxu0 %v792_v31  ;;  %815 = vmatprep.subr.bf16.mxu1 %v1060_v0 }
  0x87   : > { %794 = vmatprep.subr.bf16.mxu0 %v1060_v0 }
  0x89   : > { %817 = vmatpush3.bf16.msra.mxu1 %v816_v47 }
  0x8a   : > { %796 = vmatpush3.bf16.msra.mxu0 %v795_v34  ;;  %818 = vmatprep.subr.bf16.mxu1 %v1060_v0 }
  0x8d   : > { %736 = vmatmul.mubr.f32.vlgmr.msra.gmra.mrb[0].mxu0 %v323_v35  ;;  %820 = vmatpush3.bf16.msra.mxu1 %v819_v50 }
 0x160   : > { %v413_v52 = vpop.f32.mrb[0].mxu0 }
 0x161   : > { %v414_v53 = vadd.f32 %v661_v51, %v413_v52  ;;  %v737_v54 = vpop.f32.mrb[1].mxu0 }
 0x163   : > { %v418_v55 = vmul.f32 0.70710677, %v414_v53  ;;  %v417_v57 = vmul.f32 0.5, %v414_v53 }
 0x165   : > { %893 = verf.f32 %v418_v55 }
 0x16f   : > { %v894_v56 = vpop.eup %893 }
 0x170   : > { %v420_v58 = vadd.f32 1.0, %v894_v56 }
 0x172   : > { %v421_v59 = vmul.f32 %v420_v58, %v417_v57 }
 0x174   : > { %771 = vmatmul.mubr.f32.vlgmr.msra.gmra.mrb[0].mxu1 %v421_v59 }
 0x247   : > { %v511_v61 = vpop.f32.mrb[0].mxu1 }
 0x248   : > { %v512_v62 = vadd.f32 %v662_v60, %v511_v61  ;;  %v772_v63 = vpop.f32.mrb[1].mxu1 }
 0x24a   : > { %v515_v0 = vadd.f32 %v512_v62, %v414_v53 }
 0x24c   : > { %516 = vadd.xlane.f32.xlu0 %v515_v0  ;;  %v519_v1 = vmul.f32 %v515_v0, %v515_v0 }
 0x250   : > { %520 = vadd.xlane.f32.xlu0 %v519_v1 }
 0x2d9   : > { %v517_v2 = vpop.xlane.xlu0 %516 }
 0x2da   : > { %v518_v3 = vmul.f32 0.015625, %v517_v2 }
 0x2dc   : > { %v523_v5 = vmul.f32 %v518_v3, %v518_v3  ;;  %v527_v9 = vsub.f32 %v515_v0, %v518_v3 }
 0x2dd   : > { %v521_v4 = vpop.xlane.xlu0 %520 }
 0x2de   : > { %v522_v6 = vmul.f32 0.015625, %v521_v4 }
 0x2e0   : > { %v524_v7 = vsub.f32 %v522_v6, %v523_v5 }
 0x2e2   : > { %v525_v8 = vadd.f32 1e-05, %v524_v7 }
 0x2e4   : > { %895 = vrsqrt.f32 %v525_v8 }
 0x2ee   : > { %v896_v10 = vpop.eup %895 }
 0x2ef   : > { %v528_v12 = vmul.f32 %v896_v10, %v527_v9 }
 0x2f1   : > { %v536_v14 = vmul.f32 %v663_v11, %v528_v12 }
 0x2f3   : > { %v544_v15 = vadd.f32 %v664_v13, %v536_v14 }
 0x2f5   : > { %545 = vst [vmem:[%s322_s19] sm:$0xff] %v544_v15 }
 0x2f6   : > { %996 = shalt.err (!%p993_p7)
}
 0x2f7   : > { %s997_s12 = scalar_lea.hbm %s1316_s9, 128  ;;  %s1001_s21 = scalar_lea.hbm %s1366_s7, 384 }
 0x2f8   : > { %p998_p9 = scmp.ne.s32.totalorder %s1316_s9, %s997_s12  ;;  %p1002_p0 = scmp.lt.u32.totalorder %s1316_s9, %s1366_s7 }
 0x2f9   : > { %p1003_p10 = scmp.lt.u32.totalorder %s1001_s21, %s997_s12  ;;  %p1005_p1 = scmp.lt.u32.totalorder %s997_s12, %s1316_s9 }
 0x2fa   : > { %p999_p12 = pnand %p998_p9, %p1216_p4 }
 0x2fb   : > { %p1004_p11 = por %p1003_p10, %p1002_p0 }
 0x2fc   : > { %p1000_p5 = pneg %p999_p12 }
 0x2fd   : > { %p1006_p2 = por %p1005_p1, %p1004_p11 }
 0x2ff   : > { %p1007_p6 = pnand %p1006_p2, %p1000_p5 }
 0x301   : > { %1010 = shalt.err (!%p1007_p6)
}
 0x302   : > { %831 = dma.vmem_to_hbm [thread:$0]  (%p1216_p4), %s1318_s23, 128, %s1316_s9, %s547_s20  }
 0x303 PF: > { %p853_p8 = scmp.ge.s32.totalorder %s1053_s27, 2  ;;  %s572_s29 = sand.u32 1, %s1041_s24  }
 0x304   : > { %p1381_p13 = scmp.ne.s32.totalorder %s1371_s8, 0  ;;  %s573_s30 = scalar_lea.sflag [#allocation4], %s572_s29 }
 0x306   : > { %p845_p3 = pnand %p853_p8, %p1381_p13 }
 0x308   : > { %1036 = dma.done.wait (!%p845_p3), %s573_s30, 128  }
 0x309   : > { %1038 = vsyncadd (!%p845_p3), %s573_s30, 4294967168  ;;  %p21_p7 = scmp.ge.s32.totalorder %s1206_s13, 5   ;;  %s1382_s24 = smov %s1045_s25 }
 0x30a   : > { %s1383_s25 = smov %s1049_s26  ;;  %s1384_s26 = smov %s1222_s17 }
 0x30b   : > { %s1385_s27 = smov %s1206_s13  ;;  %23 = sbr.rel (!%p21_p7) target bundleno = 6 (0x6), region = 101 }
 0x312   :  { %578 = vsyncpa [#allocation3], 1 }
 0x313   :  { %580 = vsyncpa [#allocation3 + $0x1], 1 }
 0x314   :  { %581 = vsyncpa [#allocation6], 1 }
 0x315   :  { %582 = vsyncpa [#allocation4], 1 }
 0x316   :  { %584 = vsyncpa [#allocation4 + $0x1], 1 }

</bundles_post_ra>
